<compile_context>
chip_gen: v7x
topology: tpu7x:2x2x1
jax: 0.10.0
libtpu: 0.0.40
codegen_flags: <defaults>
</compile_context>

<pallas_src>
import functools
import numpy as np
import jax
import jax.numpy as jnp
from jax.experimental import pallas as pl
from jax.experimental.pallas import tpu as pltpu

NEG = -1e30  # "minus infinity" that stays finite under f32 arithmetic (0 * NEG == 0)


def _rvnn_level_kernel(code_ref,   # VMEM int32 [rows, 1]  (>=0: node_h row to gather; -1: slot absent)
                       pre_ref,    # VMEM f32   [b_pad, 3*hp]   (xz | xr | xh), biases folded
                       uzr_ref,    # VMEM bf16  [hp, 2*hp]      (U_z^T | U_r^T)
                       uh_ref,     # VMEM bf16  [hp, hp]        U_h^T
                       wout_ref,   # VMEM f32   [hp, cp]        W_out^T
                       bout_ref,   # VMEM f32   [1, cp]
                       out_ref,    # VMEM f32   [1, cp]         softmax probs (first nclass lanes valid)
                       node_h,     # scratch VMEM f32 [total_rows, hp]  per-node hidden states
                       pool_acc,   # scratch VMEM f32 [b_pad, hp]       running max-pool accumulator
                       *, b_pad, maxc, hp, nclass, zero_row, total_rows):
    l = pl.program_id(0)
    rows = maxc * b_pad

    @pl.when(l == 0)
    def _():
        # Zero the whole table: rows of not-yet-computed levels and the dedicated
        # zero-child block (last 8 rows) must be finite/zero for the one-hot gather.
        node_h[...] = jnp.zeros(node_h.shape, jnp.float32)
        pool_acc[...] = jnp.full(pool_acc.shape, NEG, jnp.float32)

    # ---- vectorized child gather: one-hot selection on the MXU (no serial row loop) ----
    code = code_ref[...]                                          # (rows, 1) int32
    gather_idx = jnp.where(code >= 0, code, zero_row)             # absent slots -> zero row
    invalid_bias = jnp.where(code >= 0, 0.0, NEG).astype(jnp.float32)   # (rows, 1)

    col = jax.lax.broadcasted_iota(jnp.int32, (rows, total_rows), 1)
    onehot = (col == gather_idx).astype(jnp.float32)              # (rows, total_rows)
    h_all = jnp.dot(onehot, node_h[...],
                    preferred_element_type=jnp.float32)           # (rows, hp)

    # ---- GRU fused over all child slots: two batched bf16 matmuls on the MXU ----
    pre = pre_ref[...]                                            # (b_pad, 3*hp)
    pre_zr = jnp.concatenate([pre[:, : 2 * hp]] * maxc, axis=0)   # (rows, 2*hp)
    pre_h = jnp.concatenate([pre[:, 2 * hp:]] * maxc, axis=0)     # (rows, hp)

    zr = jax.nn.sigmoid(pre_zr + jnp.dot(h_all.astype(jnp.bfloat16), uzr_ref[...],
                                         preferred_element_type=jnp.float32))
    z = zr[:, :hp]
    r = zr[:, hp:]
    c = jnp.tanh(pre_h + jnp.dot((h_all * r).astype(jnp.bfloat16), uh_ref[...],
                                 preferred_element_type=jnp.float32))
    # TODO(synk): nn.Dropout(0.1) on c has no deterministic equivalent; eval-mode identity.
    h_d = z * h_all + (1.0 - z) * c + invalid_bias                # absent slots pushed to -1e30

    # per-parent max over the maxc child slots (static b_pad-aligned slices, pure VPU)
    h_best = h_d[:b_pad, :]
    for d in range(1, maxc):
        h_best = jnp.maximum(h_best, h_d[d * b_pad:(d + 1) * b_pad, :])

    # dense, sublane-aligned write of the whole level + running max-pool update
    node_h[pl.ds(pl.multiple_of(l * b_pad, b_pad), b_pad), :] = h_best
    pool_acc[...] = jnp.maximum(pool_acc[...], h_best)

    # ---- epilogue: output layer + masked softmax over the first nclass lanes ----
    @pl.when(l == pl.num_programs(0) - 1)
    def _():
        fs = jnp.max(pool_acc[...], axis=0, keepdims=True)        # (1, hp)
        logits = jnp.dot(fs, wout_ref[...],
                         preferred_element_type=jnp.float32) + bout_ref[...]
        lane = jax.lax.broadcasted_iota(jnp.int32, logits.shape, 1)
        valid = lane < nclass
        logits = jnp.where(valid, logits, NEG)
        m = jnp.max(logits, axis=-1, keepdims=True)
        e = jnp.where(valid, jnp.exp(logits - m), 0.0)
        out_ref[...] = e / jnp.sum(e, axis=-1, keepdims=True)


def _pad2(a, nrows, ncols, dtype=jnp.float32):
    a = np.asarray(a, np.float32)
    out = np.zeros((nrows, ncols), np.float32)
    out[: a.shape[0], : a.shape[1]] = a
    return jnp.asarray(out, dtype)


def pooling_rvnn_forward(x_word, x_index, child_code, params, *, nclass):
    """x_word/x_index: [N, L]; child_code: [N, MAXC] int32 (>=0 child idx, -1 zero child
    (leaf slot), -2 nonexistent slot); params: dict of torch-layout weights."""
    cc = np.asarray(child_code)
    n_nodes, maxc = cc.shape
    hidden, _ = np.asarray(params["E"]).shape
    hp, cp = 128, 128

    # ---------- host: BFS level schedule + level-contiguous renumbering ----------
    # (children always have smaller indices than their parent, so a single pass works)
    level = np.zeros(n_nodes, np.int32)
    for n in range(n_nodes):
        kids = cc[n][cc[n] >= 0]
        level[n] = 0 if kids.size == 0 else int(level[kids].max()) + 1
    num_levels = int(level.max()) + 1
    counts = np.bincount(level, minlength=num_levels)
    b_pad = max(8, int(-(-int(counts.max()) // 8) * 8))           # parents / level, sublane aligned
    # TODO(synk): for dataset throughput, bucket (num_levels, b_pad, maxc) to a small set
    # of shapes so the kernel is not re-traced / recompiled per tree.

    starts = np.zeros(num_levels, np.int64)
    starts[1:] = np.cumsum(counts)[:-1]
    order = np.argsort(level, kind="stable")
    pos = np.empty(n_nodes, np.int64)
    pos[order] = np.arange(n_nodes) - starts[level[order]]
    row_of = (level.astype(np.int64) * b_pad + pos).astype(np.int32)   # node_h row per node

    rows = maxc * b_pad
    zero_row = num_levels * b_pad            # dedicated all-zero block (8 rows) after real levels
    total_rows = zero_row + 8

    # per-level, per-slot gather codes: >=0 -> node_h row (zero-children remapped to the
    # zero block), -1 -> nonexistent slot (additive -1e30 mask in-kernel)
    mapped = np.where(cc >= 0, row_of[np.clip(cc, 0, None)],
                      np.where(cc == -1, zero_row, -1)).astype(np.int32)
    code_tbl = np.full((num_levels, maxc, b_pad), -1, np.int32)
    code_tbl[level[:, None], np.arange(maxc)[None, :], pos[:, None]] = mapped
    code_tbl = code_tbl.reshape(num_levels * rows, 1)

    # ---------- XLA (outside kernel): embedding + parent pre-activations ----------
    E = jnp.asarray(params["E"], jnp.float32)                     # (H, V)
    xw = jnp.asarray(x_word, jnp.float32)
    emb = jnp.take(E.T, jnp.asarray(x_index), axis=0)             # (N, L, H); no one_hot
    xe = jnp.sum(emb * xw[..., None], axis=1)                     # (N, H)

    def lin(w, b):
        W = jnp.asarray(params[w], jnp.float32)
        return (jnp.dot(xe, W.T, precision=jax.lax.Precision.HIGHEST)
                + jnp.asarray(params[b], jnp.float32))

    xz, xr, xh = lin("Wz", "bz"), lin("Wr", "br"), lin("Wh", "bh")     # (N, H) each
    rof = jnp.asarray(row_of)
    pre = jnp.zeros((num_levels * b_pad, 3 * hp), jnp.float32)
    pre = pre.at[rof, 0:hidden].set(xz)
    pre = pre.at[rof, hp:hp + hidden].set(xr)
    pre = pre.at[rof, 2 * hp:2 * hp + hidden].set(xh)

    # ---------- packed gate / output weights (gate weights in bf16 for the MXU) ----------
    uzr_np = np.zeros((hp, 2 * hp), np.float32)
    uzr_np[:hidden, :hidden] = np.asarray(params["Uz"], np.float32).T
    uzr_np[:hidden, hp:hp + hidden] = np.asarray(params["Ur"], np.float32).T
    uzr = jnp.asarray(uzr_np, jnp.bfloat16)
    uh = _pad2(np.asarray(params["Uh"]).T, hp, hp, jnp.bfloat16)
    wout = _pad2(np.asarray(params["Wout"]).T, hp, cp)
    bout = _pad2(np.asarray(params["bout"])[None, :], 1, cp)

    # ---------- VMEM budget (v7x: 64 MiB physical / 32 MiB scoped default) ----------
    vmem_need = (
        total_rows * hp * 4 + b_pad * hp * 4                              # persistent scratch
        + 2 * (rows * 4 + b_pad * 3 * hp * 4)                             # double-buffered level inputs
        + 2 * (hp * 2 * hp * 2 + hp * hp * 2 + hp * cp * 4 + 2 * cp * 4)  # weights + output
        + rows * total_rows * 4 + 4 * rows * 3 * hp * 4                   # live in-kernel temporaries
    )
    vmem_limit = int(min(max(2 * vmem_need, 32 << 20), 64 << 20))

    kernel = functools.partial(_rvnn_level_kernel, b_pad=b_pad, maxc=maxc, hp=hp,
                               nclass=nclass, zero_row=zero_row, total_rows=total_rows)

    out = pl.pallas_call(
        kernel,
        out_shape=jax.ShapeDtypeStruct((1, cp), jnp.float32),
        grid_spec=pltpu.PrefetchScalarGridSpec(
            num_scalar_prefetch=0,
            grid=(num_levels,),
            in_specs=[
                pl.BlockSpec((rows, 1), lambda l: (l, 0)),        # this level's gather codes
                pl.BlockSpec((b_pad, 3 * hp), lambda l: (l, 0)),  # this level's pre-activations
                pl.BlockSpec((hp, 2 * hp), lambda l: (0, 0)),     # (Uz^T | Ur^T)  bf16
                pl.BlockSpec((hp, hp), lambda l: (0, 0)),         # Uh^T           bf16
                pl.BlockSpec((hp, cp), lambda l: (0, 0)),         # Wout^T
                pl.BlockSpec((1, cp), lambda l: (0, 0)),          # b_out
            ],
            out_specs=pl.BlockSpec((1, cp), lambda l: (0, 0)),
            scratch_shapes=[
                pltpu.VMEM((total_rows, hp), jnp.float32),        # node hidden-state table
                pltpu.VMEM((b_pad, hp), jnp.float32),             # running max-pool accumulator
            ],
        ),
        compiler_params=pltpu.CompilerParams(
            dimension_semantics=("arbitrary",),                   # levels are inherently sequential
            vmem_limit_bytes=vmem_limit,
        ),
        # TODO(synk): to use both v7x TensorCores, add a leading "parallel" grid axis that
        # batches independent trees into the same (level, b_pad) layout.
    )(jnp.asarray(code_tbl), pre, uzr, uh, wout, bout)
    return out[0, :nclass]


def _reference(x_word, x_index, child_code, p):
    """Pure numpy replica of PoolingRvNN.forward (eval-mode dropout)."""
    def sig(x):
        return 1.0 / (1.0 + np.exp(-x))
    H = p["Wz"].shape[0]
    node_h = []
    for n in range(child_code.shape[0]):
        xe = (p["E"][:, x_index[n]] * x_word[n]).sum(axis=1)
        hs = []
        for code in child_code[n]:
            if code == -2:
                continue
            ht = node_h[code] if code >= 0 else np.zeros(H, np.float32)
            z = sig(p["Wz"] @ xe + p["Uz"] @ ht + p["bz"])
            r = sig(p["Wr"] @ xe + p["Ur"] @ ht + p["br"])
            c = np.tanh(p["Wh"] @ xe + p["Uh"] @ (ht * r) + p["bh"])
            hs.append(z * ht + (1.0 - z) * c)
        node_h.append(np.max(np.stack(hs), axis=0))
    fs = np.max(np.stack(node_h), axis=0)
    logits = p["Wout"] @ fs + p["bout"]
    e = np.exp(logits - logits.max())
    return e / e.sum()


if __name__ == "__main__":
    WORD_DIM, HIDDEN, NCLASS, DEGREE, L = 24, 16, 4, 2, 3

    # Tree: nodes 0..3 are leaves; node 4 has children {0,1}; node 5 has single child {3};
    # node 6 (root) has children {4,5}.  Encoding: >=0 child idx, -1 zero child (leaf slot),
    # -2 non-existent slot.
    child_code = jnp.array(
        [[-1, -1], [-1, -1], [-1, -1], [-1, -1],
         [0, 1],
         [3, -2],
         [4, 5]], dtype=jnp.int32)
    N = child_code.shape[0]

    key = jax.random.PRNGKey(0)
    ks = jax.random.split(key, 12)
    x_index = jax.random.randint(ks[0], (N, L), 0, WORD_DIM)
    x_word = jax.random.normal(ks[1], (N, L), dtype=jnp.float32)

    def mat(k, shape):  # init_matrix: N(0, 0.1); init_vector: zeros
        return 0.1 * jax.random.normal(k, shape, dtype=jnp.float32)

    params = dict(
        E=mat(ks[2], (HIDDEN, WORD_DIM)),
        Wz=mat(ks[3], (HIDDEN, HIDDEN)), Uz=mat(ks[4], (HIDDEN, HIDDEN)), bz=jnp.zeros((HIDDEN,), jnp.float32),
        Wr=mat(ks[5], (HIDDEN, HIDDEN)), Ur=mat(ks[6], (HIDDEN, HIDDEN)), br=jnp.zeros((HIDDEN,), jnp.float32),
        Wh=mat(ks[7], (HIDDEN, HIDDEN)), Uh=mat(ks[8], (HIDDEN, HIDDEN)), bh=jnp.zeros((HIDDEN,), jnp.float32),
        Wout=mat(ks[9], (NCLASS, HIDDEN)), bout=jnp.zeros((NCLASS,), jnp.float32),
    )

    pred = pooling_rvnn_forward(x_word, x_index, child_code, params, nclass=NCLASS)
    pred = jax.block_until_ready(pred)

    ref = _reference(np.asarray(x_word), np.asarray(x_index), np.asarray(child_code),
                     {k: np.asarray(v) for k, v in params.items()})
    assert pred.shape == (NCLASS,)
    assert np.all(np.isfinite(np.asarray(pred)))
    assert np.allclose(np.asarray(pred), ref, atol=5e-3, rtol=1e-2), (np.asarray(pred), ref)
    print("KERNEL_OK")
</pallas_src>

<mosaic_0001>
module attributes {stable_mosaic.version = 11 : i64} {
  func.func @_rvnn_level_kernel(%arg0: i32, %arg1: memref<16x1xi32, #tpu.memory_space<vmem>>, %arg2: memref<8x384xf32, #tpu.memory_space<vmem>>, %arg3: memref<128x256xbf16, #tpu.memory_space<vmem>>, %arg4: memref<128x128xbf16, #tpu.memory_space<vmem>>, %arg5: memref<128x128xf32, #tpu.memory_space<vmem>>, %arg6: memref<1x128xf32, #tpu.memory_space<vmem>>, %arg7: memref<1x128xf32, #tpu.memory_space<vmem>>, %arg8: memref<32x128xf32, #tpu.memory_space<vmem>>, %arg9: memref<8x128xf32, #tpu.memory_space<vmem>>) attributes {dimension_semantics = [#tpu.dimension_semantics<arbitrary>], iteration_bounds = array<i64: 3>, scalar_prefetch = 0 : i64, scratch_operands = 2 : i64, tpu.core_type = #tpu.core_type<tc>, window_params = [{transform_indices = @transform_0, window_bounds = array<i64: 16, 1>}, {transform_indices = @transform_1, window_bounds = array<i64: 8, 384>}, {pipeline_mode = #tpu.pipeline_mode<synchronous>, transform_indices = @transform_2, window_bounds = array<i64: 128, 256>}, {pipeline_mode = #tpu.pipeline_mode<synchronous>, transform_indices = @transform_3, window_bounds = array<i64: 128, 128>}, {pipeline_mode = #tpu.pipeline_mode<synchronous>, transform_indices = @transform_4, window_bounds = array<i64: 128, 128>}, {pipeline_mode = #tpu.pipeline_mode<synchronous>, transform_indices = @transform_5, window_bounds = array<i64: 1, 128>}, {pipeline_mode = #tpu.pipeline_mode<synchronous>, transform_indices = @transform_6, window_bounds = array<i64: 1, 128>}]} {
    %c0_i32 = arith.constant 0 : i32
    %0 = arith.cmpi eq, %arg0, %c0_i32 : i32
    %1 = arith.extui %0 : i1 to i32
    %c0_i32_0 = arith.constant 0 : i32
    %2 = arith.cmpi ne, %1, %c0_i32_0 : i32
    scf.if %2 {
      %cst_24 = arith.constant 0.000000e+00 : f32
      %62 = vector.broadcast %cst_24 : f32 to vector<32x128xf32>
      %c0_25 = arith.constant 0 : index
      %c0_26 = arith.constant 0 : index
      %63 = vector.load %arg8[%c0_25, %c0_26] : memref<32x128xf32, #tpu.memory_space<vmem>>, vector<32x128xf32>
      tpu.vector_store %arg8[%c0_25, %c0_26], %62 {strides = array<i32>} : memref<32x128xf32, #tpu.memory_space<vmem>>, vector<32x128xf32>,
      %cst_27 = arith.constant -1.000000e+30 : f32
      %64 = vector.broadcast %cst_27 : f32 to vector<8x128xf32>
      %c0_28 = arith.constant 0 : index
      %c0_29 = arith.constant 0 : index
      %65 = vector.load %arg9[%c0_28, %c0_29] : memref<8x128xf32, #tpu.memory_space<vmem>>, vector<8x128xf32>
      tpu.vector_store %arg9[%c0_28, %c0_29], %64 {strides = array<i32>} : memref<8x128xf32, #tpu.memory_space<vmem>>, vector<8x128xf32>,
    } else {
    }
    %c0 = arith.constant 0 : index
    %c0_1 = arith.constant 0 : index
    %3 = vector.load %arg1[%c0, %c0_1] : memref<16x1xi32, #tpu.memory_space<vmem>>, vector<16x1xi32>
    %c0_i32_2 = arith.constant 0 : i32
    %4 = vector.broadcast %c0_i32_2 : i32 to vector<16x1xi32>
    %5 = arith.cmpi sge, %3, %4 : vector<16x1xi32>
    %c24_i32 = arith.constant 24 : i32
    %6 = vector.broadcast %c24_i32 : i32 to vector<16x1xi32>
    %7 = arith.select %5, %3, %6 : vector<16x1xi1>, vector<16x1xi32>
    %c0_i32_3 = arith.constant 0 : i32
    %8 = vector.broadcast %c0_i32_3 : i32 to vector<16x1xi32>
    %9 = arith.cmpi sge, %3, %8 : vector<16x1xi32>
    %cst = arith.constant 0.000000e+00 : f32
    %cst_4 = arith.constant -1.000000e+30 : f32
    %10 = vector.broadcast %cst : f32 to vector<16x1xf32>
    %11 = vector.broadcast %cst_4 : f32 to vector<16x1xf32>
    %12 = arith.select %9, %10, %11 : vector<16x1xi1>, vector<16x1xf32>
    %13 = tpu.iota {dimensions = array<i32: 1>} : vector<16x32xi32>
    %14 = vector.broadcast %7 : vector<16x1xi32> to vector<16x32xi32>
    %15 = arith.cmpi eq, %13, %14 : vector<16x32xi32>
    %16 = arith.extui %15 : vector<16x32xi1> to vector<16x32xi32>
    %17 = arith.sitofp %16 : vector<16x32xi32> to vector<16x32xf32>
    %c0_5 = arith.constant 0 : index
    %c0_6 = arith.constant 0 : index
    %18 = vector.load %arg8[%c0_5, %c0_6] : memref<32x128xf32, #tpu.memory_space<vmem>>, vector<32x128xf32>
    %cst_7 = arith.constant dense<0.000000e+00> : vector<16x128xf32>
    %19 = tpu.matmul %17, %18, %cst_7 {dimension_numbers = #tpu.dot_dimension_numbers<[1], [0], [0], [1], [0, 0, 1, 1], [], []>} : vector<16x32xf32>, vector<32x128xf32>, vector<16x128xf32> -> vector<16x128xf32>
    %c0_8 = arith.constant 0 : index
    %c0_9 = arith.constant 0 : index
    %20 = vector.load %arg2[%c0_8, %c0_9] : memref<8x384xf32, #tpu.memory_space<vmem>>, vector<8x384xf32>
    %21 = vector.extract_strided_slice %20 {offsets = [0, 0], sizes = [8, 256], strides = [1, 1]} : vector<8x384xf32> to vector<8x256xf32>
    %22 = tpu.concatenate %21, %21 in 0 : vector<8x256xf32>, vector<8x256xf32> -> vector<16x256xf32>
    %23 = vector.extract_strided_slice %20 {offsets = [0, 256], sizes = [8, 128], strides = [1, 1]} : vector<8x384xf32> to vector<8x128xf32>
    %24 = tpu.concatenate %23, %23 in 0 : vector<8x128xf32>, vector<8x128xf32> -> vector<16x128xf32>
    %25 = arith.truncf %19 : vector<16x128xf32> to vector<16x128xbf16>
    %c0_10 = arith.constant 0 : index
    %c0_11 = arith.constant 0 : index
    %26 = vector.load %arg3[%c0_10, %c0_11] : memref<128x256xbf16, #tpu.memory_space<vmem>>, vector<128x256xbf16>
    %cst_12 = arith.constant dense<0.000000e+00> : vector<16x256xf32>
    %27 = tpu.matmul %25, %26, %cst_12 {dimension_numbers = #tpu.dot_dimension_numbers<[1], [0], [0], [1], [0, 0, 1, 1], [], []>} : vector<16x128xbf16>, vector<128x256xbf16>, vector<16x256xf32> -> vector<16x256xf32>
    %28 = arith.addf %22, %27 : vector<16x256xf32>
    %29 = arith.negf %28 : vector<16x256xf32>
    %30 = math.exp %29 : vector<16x256xf32>
    %cst_13 = arith.constant 1.000000e+00 : f32
    %31 = vector.broadcast %cst_13 : f32 to vector<16x256xf32>
    %32 = arith.addf %31, %30 : vector<16x256xf32>
    %33 = arith.divf %31, %32 : vector<16x256xf32>
    %34 = vector.extract_strided_slice %33 {offsets = [0, 0], sizes = [16, 128], strides = [1, 1]} : vector<16x256xf32> to vector<16x128xf32>
    %35 = vector.extract_strided_slice %33 {offsets = [0, 128], sizes = [16, 128], strides = [1, 1]} : vector<16x256xf32> to vector<16x128xf32>
    %36 = arith.mulf %19, %35 : vector<16x128xf32>
    %37 = arith.truncf %36 : vector<16x128xf32> to vector<16x128xbf16>
    %c0_14 = arith.constant 0 : index
    %c0_15 = arith.constant 0 : index
    %38 = vector.load %arg4[%c0_14, %c0_15] : memref<128x128xbf16, #tpu.memory_space<vmem>>, vector<128x128xbf16>
    %cst_16 = arith.constant dense<0.000000e+00> : vector<16x128xf32>
    %39 = tpu.matmul %37, %38, %cst_16 {dimension_numbers = #tpu.dot_dimension_numbers<[1], [0], [0], [1], [0, 0, 1, 1], [], []>} : vector<16x128xbf16>, vector<128x128xbf16>, vector<16x128xf32> -> vector<16x128xf32>
    %40 = arith.addf %24, %39 : vector<16x128xf32>
    %41 = math.tanh %40 : vector<16x128xf32>
    %42 = arith.mulf %34, %19 : vector<16x128xf32>
    %cst_17 = arith.constant 1.000000e+00 : f32
    %43 = vector.broadcast %cst_17 : f32 to vector<16x128xf32>
    %44 = arith.subf %43, %34 : vector<16x128xf32>
    %45 = arith.mulf %44, %41 : vector<16x128xf32>
    %46 = arith.addf %42, %45 : vector<16x128xf32>
    %47 = vector.broadcast %12 : vector<16x1xf32> to vector<16x128xf32>
    %48 = arith.addf %46, %47 : vector<16x128xf32>
    %49 = vector.extract_strided_slice %48 {offsets = [0, 0], sizes = [8, 128], strides = [1, 1]} : vector<16x128xf32> to vector<8x128xf32>
    %50 = vector.extract_strided_slice %48 {offsets = [8, 0], sizes = [8, 128], strides = [1, 1]} : vector<16x128xf32> to vector<8x128xf32>
    %51 = arith.maximumf %49, %50 : vector<8x128xf32>
    %c8_i32 = arith.constant 8 : i32
    %52 = arith.muli %arg0, %c8_i32 : i32
    %53 = tpu.assume_multiple %52, 8 : i32
    %54 = arith.index_cast %53 : i32 to index
    %c0_18 = arith.constant 0 : index
    %55 = vector.load %arg8[%54, %c0_18] : memref<32x128xf32, #tpu.memory_space<vmem>>, vector<8x128xf32>
    tpu.vector_store %arg8[%54, %c0_18], %51 {strides = array<i32>} : memref<32x128xf32, #tpu.memory_space<vmem>>, vector<8x128xf32>,
    %c0_19 = arith.constant 0 : index
    %c0_20 = arith.constant 0 : index
    %56 = vector.load %arg9[%c0_19, %c0_20] : memref<8x128xf32, #tpu.memory_space<vmem>>, vector<8x128xf32>
    %57 = arith.maximumf %56, %51 : vector<8x128xf32>
    %c0_21 = arith.constant 0 : index
    %c0_22 = arith.constant 0 : index
    %58 = vector.load %arg9[%c0_21, %c0_22] : memref<8x128xf32, #tpu.memory_space<vmem>>, vector<8x128xf32>
    tpu.vector_store %arg9[%c0_21, %c0_22], %57 {strides = array<i32>} : memref<8x128xf32, #tpu.memory_space<vmem>>, vector<8x128xf32>,
    %c2_i32 = arith.constant 2 : i32
    %59 = arith.cmpi eq, %arg0, %c2_i32 : i32
    %60 = arith.extui %59 : i1 to i32
    %c0_i32_23 = arith.constant 0 : i32
    %61 = arith.cmpi ne, %60, %c0_i32_23 : i32
    scf.if %61 {
      %c0_24 = arith.constant 0 : index
      %c0_25 = arith.constant 0 : index
      %62 = vector.load %arg9[%c0_24, %c0_25] : memref<8x128xf32, #tpu.memory_space<vmem>>, vector<8x128xf32>
      %cst_26 = arith.constant dense<0xFF800000> : vector<128xf32>
      %63 = vector.multi_reduction <maximumf>, %62, %cst_26 [0] : vector<8x128xf32> to vector<128xf32>
      %64 = vector.shape_cast %63 : vector<128xf32> to vector<1x128xf32>
      %c0_27 = arith.constant 0 : index
      %c0_28 = arith.constant 0 : index
      %65 = vector.load %arg5[%c0_27, %c0_28] : memref<128x128xf32, #tpu.memory_space<vmem>>, vector<128x128xf32>
      %cst_29 = arith.constant dense<0.000000e+00> : vector<1x128xf32>
      %66 = tpu.matmul %64, %65, %cst_29 {dimension_numbers = #tpu.dot_dimension_numbers<[1], [0], [0], [1], [0, 0, 1, 1], [], []>} : vector<1x128xf32>, vector<128x128xf32>, vector<1x128xf32> -> vector<1x128xf32>
      %c0_30 = arith.constant 0 : index
      %c0_31 = arith.constant 0 : index
      %67 = vector.load %arg6[%c0_30, %c0_31] : memref<1x128xf32, #tpu.memory_space<vmem>>, vector<1x128xf32>
      %68 = arith.addf %66, %67 : vector<1x128xf32>
      %69 = tpu.iota {dimensions = array<i32: 1>} : vector<1x128xi32>
      %c4_i32 = arith.constant 4 : i32
      %70 = vector.broadcast %c4_i32 : i32 to vector<1x128xi32>
      %71 = arith.cmpi slt, %69, %70 : vector<1x128xi32>
      %cst_32 = arith.constant -1.000000e+30 : f32
      %72 = vector.broadcast %cst_32 : f32 to vector<1x128xf32>
      %73 = arith.select %71, %68, %72 : vector<1x128xi1>, vector<1x128xf32>
      %cst_33 = arith.constant dense<0xFF800000> : vector<1xf32>
      %74 = vector.multi_reduction <maximumf>, %73, %cst_33 [1] : vector<1x128xf32> to vector<1xf32>
      %75 = vector.shape_cast %74 : vector<1xf32> to vector<1x1xf32>
      %76 = vector.broadcast %75 : vector<1x1xf32> to vector<1x128xf32>
      %77 = arith.subf %73, %76 : vector<1x128xf32>
      %78 = math.exp %77 : vector<1x128xf32>
      %cst_34 = arith.constant 0.000000e+00 : f32
      %79 = vector.broadcast %cst_34 : f32 to vector<1x128xf32>
      %80 = arith.select %71, %78, %79 : vector<1x128xi1>, vector<1x128xf32>
      %cst_35 = arith.constant dense<0.000000e+00> : vector<1xf32>
      %81 = vector.multi_reduction <add>, %80, %cst_35 [1] : vector<1x128xf32> to vector<1xf32>
      %82 = vector.shape_cast %81 : vector<1xf32> to vector<1x1xf32>
      %83 = vector.broadcast %82 : vector<1x1xf32> to vector<1x128xf32>
      %84 = arith.divf %80, %83 : vector<1x128xf32>
      %c0_36 = arith.constant 0 : index
      %c0_37 = arith.constant 0 : index
      %85 = vector.load %arg7[%c0_36, %c0_37] : memref<1x128xf32, #tpu.memory_space<vmem>>, vector<1x128xf32>
      tpu.vector_store %arg7[%c0_36, %c0_37], %84 {strides = array<i32>} : memref<1x128xf32, #tpu.memory_space<vmem>>, vector<1x128xf32>,
    } else {
    }
    return
  }
  func.func @transform_0(%arg0: i32) -> (i32, i32) {
    %c0_i32 = arith.constant 0 : i32
    %c0_i32_0 = arith.constant 0 : i32
    return %arg0, %c0_i32 : i32, i32
  }
  func.func @transform_1(%arg0: i32) -> (i32, i32) {
    %c0_i32 = arith.constant 0 : i32
    %c0_i32_0 = arith.constant 0 : i32
    return %arg0, %c0_i32 : i32, i32
  }
  func.func @transform_2(%arg0: i32) -> (i32, i32) {
    %c0_i32 = arith.constant 0 : i32
    %c0_i32_0 = arith.constant 0 : i32
    %c0_i32_1 = arith.constant 0 : i32
    return %c0_i32, %c0_i32_0 : i32, i32
  }
  func.func @transform_3(%arg0: i32) -> (i32, i32) {
    %c0_i32 = arith.constant 0 : i32
    %c0_i32_0 = arith.constant 0 : i32
    %c0_i32_1 = arith.constant 0 : i32
    return %c0_i32, %c0_i32_0 : i32, i32
  }
  func.func @transform_4(%arg0: i32) -> (i32, i32) {
    %c0_i32 = arith.constant 0 : i32
    %c0_i32_0 = arith.constant 0 : i32
    %c0_i32_1 = arith.constant 0 : i32
    return %c0_i32, %c0_i32_0 : i32, i32
  }
  func.func @transform_5(%arg0: i32) -> (i32, i32) {
    %c0_i32 = arith.constant 0 : i32
    %c0_i32_0 = arith.constant 0 : i32
    %c0_i32_1 = arith.constant 0 : i32
    return %c0_i32, %c0_i32_0 : i32, i32
  }
  func.func @transform_6(%arg0: i32) -> (i32, i32) {
    %c0_i32 = arith.constant 0 : i32
    %c0_i32_0 = arith.constant 0 : i32
    %c0_i32_1 = arith.constant 0 : i32
    return %c0_i32, %c0_i32_0 : i32, i32
  }
}

</mosaic_0001>

<bundles_post_ra>
// kernel: tpu_custom_call.1
= control target key start
LH: loop header
LB: loop body
LE: loop exit
PB: predicated region body
PF: predicated region fallthrough
CT: control target
= control target key end

     0   :  { %11 = vsyncpa [#allocation5], 0  ;;  %s1815_s0 = inlined_call_operand.vmem [shape: s32[48,1], index: 0, kind: input, shape index: {}]   ;;  %s1816_s1 = inlined_call_operand.hbm [shape: f32[24,384], index: 1, kind: input, shape index: {}]   ;;  %s1817_s2 = inlined_call_operand.hbm [shape: bf16[128,256], index: 2, kind: input, shape index: {}]   ;;  %s1818_s3 = inlined_call_operand.hbm [shape: bf16[128,128], index: 3, kind: input, shape index: {}]   ;;  %s1819_s4 = inlined_call_operand.hbm [shape: f32[128,128], index: 4, kind: input, shape index: {}]   ;;  %s1820_s5 = inlined_call_operand.vmem [shape: f32[1,128], index: 5, kind: input, shape index: {}]   ;;  %s1821_s6 = inlined_call_operand.hbm [shape: f32[1,128], index: 6, kind: output, shape index: {}]  }
   0x1   :  { %13 = vsyncpa [#allocation5 + $0x1], 0 }
   0x2   :  { %14 = vsyncpa [#allocation8], 0 }
   0x3   :  { %15 = vsyncpa [#allocation11], 0 }
   0x4   :  { %16 = vsyncpa [#allocation6], 0  ;;  %s1538_s21 = smov 0   ;;  %s1540_s22 = smov 0  }
   0x5   :  { %s1542_s23 = smov 0   ;;  %s1544_s24 = smov 0  }
   0x6 LB: > { %s1557_s25 = sadd.s32 4294967295, %s1483_s24   ;;  %p68_p0 = scmp.ne.s32.totalorder %s1475_s22, %s1471_s21  ;;  %s1483_s24 = sphi %s1544_s24, %s1842_s24   ;;  %s1479_s23 = sphi %s1542_s23, %s1841_s23   ;;  %s1475_s22 = sphi %s1540_s22, %s1840_s22   ;;  %s1471_s21 = sphi %s1538_s21, %s1839_s21  }
   0x7   : > { %p1822_p1 = scmp.eq.s32.totalorder %s1557_s25, 0  ;;  %p965_p2 = scmp.ge.s32.totalorder %s1483_s24, 1 }
   0x8   : > { %p184_p3 = scmp.lt.s32.totalorder %s1483_s24, 4  ;;  %s1485_s28 = smov [#allocation7]  }
   0x9   : > { %p1566_p5 = por %p1822_p1, %p68_p0  ;;  %s196_s29 = sshll.u32 %s1485_s28, 4  ;;  %s197_s29 = int_to_ptr.vmem [resolvable:$true] %s196_s29 }
   0xa   : > { %p1570_p6 = pnand %p965_p2, %p184_p3  ;;  %s1486_s7 = smov [#allocation9]  }
   0xb   : > { %s1826_s26 = scalar_select %p1566_p5, 1, 0 }
   0xc   : > { %s1827_s27 = scalar_select %p1570_p6, 1, 0 }
   0xd   : > { %p1167_p7 = pneg %p1570_p6  ;;  %s209_s8 = sshll.u32 %s1486_s7, 4  ;;  %s1582_s8 = int_to_ptr.vmem [resolvable:$true] %s209_s8 }
   0xe   : > { %s1297_s11 = scalar_lea.hbm %s1817_s2, 2048 }
   0xf   : > { %p1578_p8 = pnand %p1167_p7, %p1822_p1  ;;  %p1298_p9 = scmp.ne.s32.totalorder %s1817_s2, %s1297_s11 }
  0x10   : > { %p1304_p13 = scmp.lt.u32.totalorder %s1297_s11, %s1817_s2 }
  0x11   : > { %p1592_p10 = pneg %p1578_p8 }
  0x13   : > { %p1300_p11 = pnand %p1592_p10, %p1298_p9 }
  0x15   : > { %p1301_p12 = pneg %p1300_p11 }
  0x17   : > { %p1306_p0 = pnand %p1304_p13, %p1301_p12 }
  0x19   : > { %1309 = shalt.err (!%p1306_p0)
}
  0x1a   : > { %s1310_s17 = scalar_lea.vmem %s197_s29, 2048  ;;  %p1318_p4 = scmp.lt.s32.totalorder %s197_s29, %s197_s29 }
  0x1b   : > { %p1311_p2 = scmp.ne.s32.totalorder %s197_s29, %s1310_s17  ;;  %p1319_p1 = scmp.lt.s32.totalorder %s1310_s17, %s1310_s17 }
  0x1d   : > { %p1313_p3 = pnand %p1311_p2, %p1592_p10  ;;  %p1320_p5 = por %p1319_p1, %p1318_p4 }
  0x1f   : > { %p1314_p7 = pneg %p1313_p3 }
  0x21   : > { %p1321_p6 = pnand %p1320_p5, %p1314_p7 }
  0x23   : > { %1324 = shalt.err (!%p1321_p6)
}
  0x24   : > { %s1825_s18 = smov 128   ;;  %s1488_s19 = smov 8  }
  0x25   : > { %1170 = dma.hbm_to_vmem [thread:$0]  (!%p1578_p8), %s1817_s2, 2048, %s197_s29, [#allocation8], %s1825_s18, %s1825_s18, %s1488_s19  }
  0x26   : > { %s1325_s9 = scalar_lea.hbm %s1818_s3, 1024 }
  0x27   : > { %p1326_p1 = scmp.ne.s32.totalorder %s1818_s3, %s1325_s9  ;;  %p1332_p6 = scmp.lt.u32.totalorder %s1325_s9, %s1818_s3 }
  0x29   : > { %p1328_p4 = pnand %p1326_p1, %p1592_p10 }
  0x2b   : > { %p1329_p5 = pneg %p1328_p4 }
  0x2d   : > { %p1334_p9 = pnand %p1332_p6, %p1329_p5 }
  0x2f   : > { %1337 = shalt.err (!%p1334_p9)
}
  0x30   : > { %s1338_s29 = scalar_lea.vmem %s1582_s8, 1024  ;;  %p1346_p0 = scmp.lt.s32.totalorder %s1582_s8, %s1582_s8 }
  0x31   : > { %p1339_p11 = scmp.ne.s32.totalorder %s1582_s8, %s1338_s29  ;;  %p1347_p2 = scmp.lt.s32.totalorder %s1338_s29, %s1338_s29 }
  0x33   : > { %p1341_p12 = pnand %p1339_p11, %p1592_p10  ;;  %p1348_p3 = por %p1347_p2, %p1346_p0 }
  0x35   : > { %p1342_p13 = pneg %p1341_p12 }
  0x37   : > { %p1349_p7 = pnand %p1348_p3, %p1342_p13 }
  0x39   : > { %1352 = shalt.err (!%p1349_p7)
}
  0x3a   : > { %s1489_s15 = smov 64   ;;  %s1490_s16 = smov 4  }
  0x3b   : > { %1173 = dma.hbm_to_vmem [thread:$0]  (!%p1578_p8), %s1818_s3, 1024, %s1582_s8, [#allocation8], %s1489_s15, %s1489_s15, %s1490_s16  }
  0x3c   : > { %s1491_s21 = smov [#allocation10]   ;;  %s1635_s7 = sadd.s32 1, %s1483_s24  }
  0x3d   : > { %s222_s28 = sshll.u32 %s1491_s21, 4  ;;  %s1353_s11 = scalar_lea.hbm %s1819_s4, 2048  ;;  %s223_s28 = int_to_ptr.vmem [resolvable:$true] %s222_s28 }
  0x3e   : > { %p1354_p1 = scmp.ne.s32.totalorder %s1819_s4, %s1353_s11  ;;  %p1360_p6 = scmp.lt.u32.totalorder %s1353_s11, %s1819_s4 }
  0x40   : > { %p1356_p4 = pnand %p1354_p1, %p1592_p10 }
  0x42   : > { %p1357_p5 = pneg %p1356_p4 }
  0x44   : > { %p1362_p9 = pnand %p1360_p6, %p1357_p5 }
  0x46   : > { %1365 = shalt.err (!%p1362_p9)
}
  0x47   : > { %s1366_s8 = scalar_lea.vmem %s223_s28, 2048  ;;  %p1374_p0 = scmp.lt.s32.totalorder %s223_s28, %s223_s28 }
  0x48   : > { %p1367_p11 = scmp.ne.s32.totalorder %s223_s28, %s1366_s8  ;;  %p1375_p2 = scmp.lt.s32.totalorder %s1366_s8, %s1366_s8 }
  0x4a   : > { %p1369_p12 = pnand %p1367_p11, %p1592_p10  ;;  %p1376_p3 = por %p1375_p2, %p1374_p0 }
  0x4c   : > { %p1370_p13 = pneg %p1369_p12 }
  0x4e   : > { %p1377_p7 = pnand %p1376_p3, %p1370_p13 }
  0x50   : > { %1380 = shalt.err (!%p1377_p7)
}
  0x51   : > { %s1830_s15 = smov 128   ;;  %s52_s14 = ssub.s32 %s1483_s24, %s1635_s7 }
  0x52   : > { %1176 = dma.hbm_to_vmem [thread:$0]  (!%p1578_p8), %s1819_s4, 2048, %s223_s28, [#allocation11], %s1830_s15, %s1830_s15, %s1488_s19  }
  0x53   : > { %s55_s17 = sadd.s32 1, %s1479_s23  ;;  %p53_p10 = scmp.eq.s32.totalorder %s52_s14, 0 }
  0x54   : > { %p62_p1 = scmp.ne.s32.totalorder %s1479_s23, %s1475_s22  ;;  %p63_p4 = scmp.eq.s32.totalorder %s1483_s24, 0 }
  0x55   : > { %p1184_p5 = scmp.lt.s32.totalorder %s1483_s24, 3  ;;  %s248_s20 = sand.u32 1, %s1479_s23  }
  0x56   : > { %s1666_s30 = scalar_select %p53_p10, %s1479_s23, %s55_s17  }
  0x57   : > { %p64_p6 = por %p63_p4, %p62_p1  ;;  %s1146_s21 = smul.u32 24, %s248_s20 }
  0x58   : > { %s1147_s9 = smul.u32 384, %s1483_s24  ;;  %s249_s24 = scalar_lea.sflag [#allocation5], %s248_s20 }
  0x59   : > { %p1670_p9 = pnand %p1184_p5, %p64_p6  ;;  %s252_s28 = scalar_lea.vmem [#allocation4], %s1146_s21 }
  0x5a   : > { %s1677_s19 = scalar_lea.hbm %s1816_s1, %s1147_s9  ;;  %s260_s13 = sshll.u32 %s252_s28, 4  ;;  %s1679_s13 = int_to_ptr.vmem [resolvable:$true] %s260_s13 }
  0x5b   : > { %s1381_s29 = scalar_lea.hbm %s1677_s19, 384  ;;  %p1383_p11 = pneg %p1670_p9 }
  0x5c   : > { %p1382_p8 = scmp.ne.s32.totalorder %s1677_s19, %s1381_s29  ;;  %s1386_s18 = scalar_lea.hbm %s1816_s1, 1152 }
  0x5d   : > { %p1387_p0 = scmp.lt.u32.totalorder %s1677_s19, %s1816_s1  ;;  %p1388_p2 = scmp.lt.u32.totalorder %s1386_s18, %s1381_s29 }
  0x5e   : > { %p1384_p12 = pnand %p1383_p11, %p1382_p8  ;;  %p1390_p7 = scmp.lt.u32.totalorder %s1381_s29, %s1677_s19 }
  0x5f   : > { %p1389_p3 = por %p1388_p2, %p1387_p0 }
  0x60   : > { %p1385_p13 = pneg %p1384_p12 }
  0x61   : > { %p1391_p10 = por %p1390_p7, %p1389_p3 }
  0x63   : > { %p1392_p1 = pnand %p1391_p10, %p1385_p13 }
  0x65   : > { %1395 = shalt.err (!%p1392_p1)
}
  0x66   : > { %s1396_s17 = scalar_lea.vmem %s1679_s13, 384  ;;  %s1492_s20 = smov [#allocation4]  }
  0x67   : > { %p1397_p4 = scmp.ne.s32.totalorder %s1679_s13, %s1396_s17  ;;  %s1401_s21 = sshll.u32 %s1492_s20, 4  ;;  %s1402_s21 = int_to_ptr.vmem [resolvable:$false] %s1401_s21 }
  0x68   : > { %s1403_s9 = scalar_lea.vmem %s1402_s21, 768  ;;  %p1404_p8 = scmp.lt.s32.totalorder %s1679_s13, %s1402_s21 }
  0x69   : > { %p1399_p5 = pnand %p1397_p4, %p1383_p11  ;;  %p1405_p12 = scmp.lt.s32.totalorder %s1403_s9, %s1396_s17 }
  0x6b   : > { %p1400_p6 = pneg %p1399_p5  ;;  %p1406_p0 = por %p1405_p12, %p1404_p8 }
  0x6d   : > { %p1407_p2 = pnand %p1406_p0, %p1400_p6 }
  0x6f   : > { %1410 = shalt.err (!%p1407_p2)
}
  0x70   : > { %1180 = dma.hbm_to_vmem [thread:$0]  (!%p1670_p9), %s1677_s19, 384, %s1679_s13, %s249_s24  }
  0x71   : > { %p1832_p13 = scmp.ne.s32.totalorder %s1827_s27, 0 }
  0x72   : > { %s271_s11 = sand.u32 (!%p1832_p13), 1, %s1475_s22   ;;  %p1833_p11 = scmp.ne.s32.totalorder (!%p1832_p13), %s1826_s26, 0 }
  0x73   : > { %269 = sbr.rel (%p1832_p13) target bundleno = 1550 (0x60e), region = 44  ;;  %s272_s28 = scalar_lea.sflag (!%p1832_p13), [#allocation5], %s271_s11 }
  0x74   : > { %s1148_s12 = smul.u32 (!%p1832_p13), 24, %s271_s11 }
  0x76   : > { %s1709_s29 = scalar_lea.vmem (!%p1832_p13), [#allocation4], %s1148_s12 }
  0x7a   : > { %1454 = dma.done.wait (%p1833_p11), %s272_s28, 384  }
  0x7b   : > { %1456 = vsyncadd (%p1833_p11), %s272_s28, 4294966912  ;;  %p1834_p3 = scmp.eq.s32.totalorder %s1557_s25, 0 }
  0x7d   : > { %1458 = dma.done.wait (%p1834_p3), [#allocation8], 3072   ;;  %p1835_p9 = pmov %p1834_p3 }
  0x7e   : > { %p1836_p7 = pmov %p1834_p3 }
  0x7f   : > { %1460 = vsyncadd (%p1835_p9), [#allocation8], 4294964224 }
  0x80   : > { %1462 = dma.done.wait (%p1836_p7), [#allocation11], 2048   ;;  %p1837_p10 = pmov %p1834_p3 }
  0x81   : > { %s975_s27 = sshll.u32 %s1557_s25, 1  ;;  %p1838_p4 = scmp.ne.s32.totalorder %s1557_s25, 0 }
  0x82   : > { %1464 = vsyncadd (%p1837_p10), [#allocation11], 4294965248  ;;  %p317_p1 = scmp.lt.s32.totalorder %s975_s27, 5  ;;  %v1493_v0 = vmov (!%p1838_p4), 0.0   ;;  %v1494_v1 = vmov (!%p1838_p4), -1e+30  }
  0x83   : > { %326 = sbr.rel (%p1838_p4) target bundleno = 138 (0x8a), region = 64  ;;  %327 = vst [vmem:[#allocation2] sm:$0xff] (!%p1838_p4), %v1493_v0  ;;  %328 = vst [vmem:[#allocation2 + $0x8] sm:$0xff] (!%p1838_p4), %v1493_v0 }
  0x84   : > { %s1844_s27 = smov (!%p317_p1, %s975_s27), 5  ;;  %329 = vst [vmem:[#allocation2 + $0x10] sm:$0xff] (!%p1838_p4), %v1493_v0  ;;  %330 = vst [vmem:[#allocation2 + $0x18] sm:$0xff] (!%p1838_p4), %v1493_v0 }
  0x85   : > { %s976_s10 = sshll.u32 %s1844_s27, 3  ;;  %331 = vst [vmem:[#allocation3] sm:$0xff] (!%p1838_p4), %v1494_v1 }
  0x86   : > { %s320_s13 = scalar_lea.vmem %s1815_s0, %s976_s10 }
  0x8a PF: > { %v1729_v2 = vld [vmem:[%s320_s13] sm:$0xff]  ;;  %v1731_v3 = vld [vmem:[%s320_s13 + $0x8] sm:$0xff]  ;;  %v1495_v5 = vmov 0   ;;  %v1496_v16 = vmov 0.0   ;;  %v340_v28 = vlaneseq  ;;  %vm358_vm2 = vcmask 261120   ;;  %v1265_v39 = vld [vmem:[#allocation9] sm:$0xff]  }
  0x8b   : > { %v354_v4 = vld [vmem:[#allocation2] sm:$0xff]  ;;  %1239 = vset.pattern.permute.xlu0 %v1495_v5  ;;  %vm334_vm0 = vcmp.ge.s32.totalorder %v1729_v2, 0  ;;  %vm335_vm1 = vcmp.ge.s32.totalorder %v1731_v3, 0  ;;  %v355_v6 = vld [vmem:[#allocation2 + $0x8] sm:$0xff]  ;;  %572 = vmatprep.mubr.bf16.mxu1 %v1495_v5  ;;  %v356_v9 = vld [vmem:[#allocation2 + $0x10] sm:$0xff]  ;;  %vm1497_vm5 = vmmov 0  }
  0x8c   : > { %v336_v7 = vsel %vm334_vm0, %v1729_v2, 24  ;;  %v1114_v8 = vpack.c.bf16 %v355_v6, %v354_v4  ;;  %v357_v10 = vld [vmem:[#allocation2 + $0x18] sm:$0xff]  ;;  %1240 = vset.pattern.permute.xlu1 %v1495_v5  ;;  %v337_v12 = vsel %vm335_vm1, %v1731_v3, 24  ;;  %v1244_v15 = vld [vmem:[#allocation7 + $0x14] ss:$8 sps:$4 sm:$0xff]   ;;  %v1742_v29 = vand.u32 127, %v340_v28 }
  0x8d   : > { %343 = vperm.xlu0 %1239, %v336_v7   ;;  %v1118_v11 = vpack.c.bf16 %v357_v10, %v356_v9  ;;  %v1241_v13 = vld [vmem:[#allocation7 + $0x4] ss:$8 sps:$4 sm:$0xff]   ;;  %v1243_v14 = vld [vmem:[#allocation7] ss:$8 sps:$4 sm:$0xff]   ;;  %v1246_v17 = vld [vmem:[#allocation7 + $0x10] ss:$8 sps:$4 sm:$0xff]  }
  0x8e   : > { %1115 = vmatprep.subr.bf16.mxu0 %v1114_v8  ;;  %540 = vmatprep.subr.bf16.mxu1 %v1241_v13  ;;  %v1247_v18 = vld [vmem:[#allocation7 + $0x24] ss:$8 sps:$4 sm:$0xff]   ;;  %v1249_v19 = vld [vmem:[#allocation7 + $0x20] ss:$8 sps:$4 sm:$0xff]   ;;  %v1250_v20 = vld [vmem:[#allocation7 + $0x34] ss:$8 sps:$4 sm:$0xff]  }
  0x8f   : > { %1117 = vmatpush3.bf16.msra.mxu0 %v1114_v8  ;;  %541 = vmatpush1.bf16.msra.mxu1 %v1243_v14  ;;  %v1252_v21 = vld [vmem:[#allocation7 + $0x30] ss:$8 sps:$4 sm:$0xff]   ;;  %v1253_v22 = vld [vmem:[#allocation7 + $0x44] ss:$8 sps:$4 sm:$0xff]   ;;  %v1255_v23 = vld [vmem:[#allocation7 + $0x40] ss:$8 sps:$4 sm:$0xff]  }
  0x90   : > { %1119 = vmatprep.subr.bf16.mxu0 %v1118_v11  ;;  %542 = vmatprep.subr.bf16.mxu1 %v1244_v15  ;;  %v1256_v24 = vld [vmem:[#allocation7 + $0x54] ss:$8 sps:$4 sm:$0xff]   ;;  %v1258_v25 = vld [vmem:[#allocation7 + $0x50] ss:$8 sps:$4 sm:$0xff]   ;;  %v1259_v26 = vld [vmem:[#allocation7 + $0x64] ss:$8 sps:$4 sm:$0xff]  }
  0x91   : > { %346 = vperm.xlu0 %1239, %v337_v12   ;;  %v1261_v27 = vld [vmem:[#allocation7 + $0x60] ss:$8 sps:$4 sm:$0xff]   ;;  %v1262_v34 = vld [vmem:[#allocation7 + $0x74] ss:$8 sps:$4 sm:$0xff]   ;;  %v1264_v35 = vld [vmem:[#allocation7 + $0x70] ss:$8 sps:$4 sm:$0xff]  }
  0x92   : > { %v1266_v40 = vld [vmem:[#allocation9 + $0x8] sm:$0xff]   ;;  %v1267_v41 = vld [vmem:[#allocation9 + $0x10] sm:$0xff]   ;;  %v1268_v42 = vld [vmem:[#allocation9 + $0x18] sm:$0xff]   ;;  %v1498_v47 = vmov -1e+30   ;;  %s1010_s24 = sshll.u32 %s1557_s25, 3 }
  0x93   : > { %1121 = vmatpush3.bf16.msra.mxu0 %v1118_v11  ;;  %543 = vmatpush1.bf16.msra.mxu1 %v1246_v17  ;;  %v1269_v43 = vld [vmem:[#allocation9 + $0x20] sm:$0xff]   ;;  %v1270_v44 = vld [vmem:[#allocation9 + $0x28] sm:$0xff]   ;;  %v1271_v45 = vld [vmem:[#allocation9 + $0x30] sm:$0xff]   ;;  %v338_v48 = vsel %vm334_vm0, 0.0, %v1498_v47  ;;  %v339_v49 = vsel %vm335_vm1, 0.0, %v1498_v47  ;;  %s745_s8 = scalar_lea.vmem [#allocation2], %s1010_s24 }
  0x94   : > { %1059 = vmatprep.subr.bf16.mxu0 %v1496_v16  ;;  %544 = vmatprep.subr.bf16.mxu1 %v1247_v18  ;;  %v1272_v46 = vld [vmem:[#allocation9 + $0x38] sm:$0xff]   ;;  %v440_v50 = vld [vmem:[%s1709_s29] sm:$0xff]  ;;  %p1011_p5 = scmp.ne.s32.totalorder %s1557_s25, 2 }
  0x95   : > { %733 = vperm.xlu1 %1240, %v338_v48   ;;  %v441_v51 = vld [vmem:[%s1709_s29 + $0x8] sm:$0xff]  ;;  %v442_v17 = vld [vmem:[%s1709_s29 + $0x10] sm:$0xff]  ;;  %vm1500_vm6 = vmmov (!%p1011_p5), 0   ;;  %vm848_vm7 = vcmp.lt.s32.totalorder (!%p1011_p5), %v1742_v29, 4  ;;  %vm850_vm8 = vcmask (!%p1011_p5), 1040384  }
  0x96   : > { %v765_v48 = vld [vmem:[#allocation10 + $0x20] sm:$0xff] (!%p1011_p5) }
  0x97   : > { %545 = vmatpush1.bf16.msra.mxu1 %v1249_v19 }
  0x98   : > { %546 = vmatprep.subr.bf16.mxu1 %v1250_v20 }
  0x99   : > { %738 = vperm.xlu1 %1240, %v339_v49   ;;  %v766_v49 = vld [vmem:[#allocation10 + $0x28] sm:$0xff] (!%p1011_p5) }
  0x9b   : > { %547 = vmatpush1.bf16.msra.mxu1 %v1252_v21 }
  0x9c   : > { %548 = vmatprep.subr.bf16.mxu1 %v1253_v22 }
  0x9f   : > { %549 = vmatpush1.bf16.msra.mxu1 %v1255_v23 }
  0xa0   : > { %550 = vmatprep.subr.bf16.mxu1 %v1256_v24 }
  0xa3   : > { %551 = vmatpush1.bf16.msra.mxu1 %v1258_v25 }
  0xa4   : > { %552 = vmatprep.subr.bf16.mxu1 %v1259_v26 }
  0xa7   : > { %553 = vmatpush1.bf16.msra.mxu1 %v1261_v27 }
  0xa8   : > { %554 = vmatprep.subr.bf16.mxu1 %v1262_v34 }
  0xab   : > { %555 = vmatpush1.bf16.msra.mxu1 %v1264_v35 }
 0x10c   : > { %v344_v30 = vpop.permute.xlu0 %343 }
 0x10d   : > { %vm348_vm3 = vcmp.eq.s32.totalorder %v1742_v29, %v344_v30 }
 0x10e   : > { %v978_v31 = vsel %vm348_vm3, 1.0, %v1496_v16 }
 0x10f   : > { %1056 = vmatprep.mubr.msk.f32.mxu0 %vm358_vm2, %v978_v31 }
 0x110   : > { %v347_v32 = vpop.permute.xlu0 %346 }
 0x111   : > { %vm349_vm4 = vcmp.eq.s32.totalorder %v1742_v29, %v347_v32 }
 0x112   : > { %v979_v33 = vsel %vm349_vm4, 1.0, %v1496_v16 }
 0x113   : > { %1057 = vmatmul.mubr.msk.f32.vlgmr.msra.gmra.mrb[0].mxu0 %vm358_vm2, %v979_v33 }
 0x114   : > { %1060 = vmatpush3.bf16.msra.mxu0 %v1265_v39  ;;  %1075 = vmatprep.mubr.msk.bf16.mxu0 %vm1497_vm5, %v1496_v16  ;;  %v734_v26 = vpop.permute.xlu1 %733 }
 0x115   : > { %1061 = vmatprep.subr.bf16.mxu0 %v1496_v16 }
 0x118   : > { %1062 = vmatpush3.bf16.msra.mxu0 %v1266_v40  ;;  %v739_v34 = vpop.permute.xlu1 %738  ;;  %v761_v40 = vld [vmem:[#allocation10] sm:$0xff] (!%p1011_p5) }
 0x119   : > { %1063 = vmatprep.subr.bf16.mxu0 %v1496_v16 }
 0x11c   : > { %1064 = vmatpush3.bf16.msra.mxu0 %v1267_v41  ;;  %v762_v41 = vld [vmem:[#allocation10 + $0x8] sm:$0xff] (!%p1011_p5) }
 0x11d   : > { %1065 = vmatprep.subr.bf16.mxu0 %v1496_v16 }
 0x120   : > { %1066 = vmatpush3.bf16.msra.mxu0 %v1268_v42  ;;  %v763_v42 = vld [vmem:[#allocation10 + $0x10] sm:$0xff] (!%p1011_p5) }
 0x121   : > { %1067 = vmatprep.subr.bf16.mxu0 %v1496_v16 }
 0x124   : > { %1068 = vmatpush3.bf16.msra.mxu0 %v1269_v43  ;;  %v1499_v43 = vmov (!%p1011_p5), 0.0|0.0  }
 0x125   : > { %1069 = vmatprep.subr.bf16.mxu0 %v1496_v16 }
 0x128   : > { %1070 = vmatpush3.bf16.msra.mxu0 %v1270_v44  ;;  %v1123_v44 = vpack.c.bf16 (!%p1011_p5), %v762_v41, %v761_v40 }
 0x129   : > { %1071 = vmatprep.subr.bf16.mxu0 %v1496_v16 }
 0x12c   : > { %1072 = vmatpush3.bf16.msra.mxu0 %v1271_v45  ;;  %v764_v45 = vld [vmem:[#allocation10 + $0x18] sm:$0xff] (!%p1011_p5) }
 0x12d   : > { %1073 = vmatprep.subr.bf16.mxu0 %v1496_v16  ;;  %v1126_v47 = vpack.c.bf16 (!%p1011_p5), %v764_v45, %v763_v42 }
 0x130   : > { %1074 = vmatpush3.bf16.msra.mxu0 %v1272_v46  ;;  %v1501_v46 = vmov (!%p1011_p5), 0.0  }
 0x131   : > { %1122 = vmatprep.subr.bf16.mxu0 (!%p1011_p5), %v1499_v43 }
 0x1e6   : > { %v1748_v36 = vpop.f32.mrb[0].mxu0 }
 0x1e7   : > { %v1750_v37 = vpop.f32.mrb[1].mxu0 }
 0x1e8   : > { %v443_v38 = vpack.c.bf16 %v1748_v36, %v1750_v37 }
 0x1ea   : > { %573 = vmatmul.mubr.bf16.vlgmr.msra.gmra.mrb[0].mxu1 %v443_v38 }
 0x2bd   : > { %v574_v52 = vpop.f32.mrb[0].mxu1 }
 0x2be   : > { %v583_v53 = vadd.f32 %v574_v52, %v440_v50  ;;  %v576_v54 = vpop.f32.mrb[1].mxu1  ;;  %v767_v52 = vld [vmem:[#allocation10 + $0x30] sm:$0xff] (!%p1011_p5) }
 0x2bf   : > { %v584_v55 = vadd.f32 %v576_v54, %v441_v51  ;;  %v578_v56 = vpop.f32.mrb[2].mxu1 }
 0x2c0   : > { %v998_v57 = vmul.f32 -1.442695, %v583_v53  ;;  %v585_v58 = vadd.f32 %v578_v56, %v440_v50  ;;  %v580_v59 = vpop.f32.mrb[3].mxu1  ;;  %v1129_v50 = vpack.c.bf16 (!%p1011_p5), %v766_v49, %v765_v48  ;;  %v768_v53 = vld [vmem:[#allocation10 + $0x38] sm:$0xff] (!%p1011_p5)  ;;  %v769_v56 = vld [vmem:[#allocation10 + $0x40] sm:$0xff] (!%p1011_p5) }
 0x2c1   : > { %v999_v60 = vmul.f32 -1.442695, %v584_v55  ;;  %v586_v61 = vadd.f32 %v580_v59, %v441_v51  ;;  %v1132_v55 = vpack.c.bf16 (!%p1011_p5), %v768_v53, %v767_v52 }
 0x2c2   : > { %1273 = vpow2.f32 %v998_v57  ;;  %v1000_v62 = vmul.f32 -1.442695, %v585_v58  ;;  %v770_v57 = vld [vmem:[#allocation10 + $0x48] sm:$0xff] (!%p1011_p5) }
 0x2c3   : > { %1275 = vpow2.f32 %v999_v60  ;;  %v1001_v63 = vmul.f32 -1.442695, %v586_v61  ;;  %v1135_v59 = vpack.c.bf16 (!%p1011_p5), %v770_v57, %v769_v56  ;;  %v771_v60 = vld [vmem:[#allocation10 + $0x50] sm:$0xff] (!%p1011_p5)  ;;  %v772_v61 = vld [vmem:[#allocation10 + $0x58] sm:$0xff] (!%p1011_p5) }
 0x2c4   : > { %1277 = vpow2.f32 %v1000_v62 }
 0x2c5   : > { %1279 = vpow2.f32 %v1001_v63  ;;  %v1138_v63 = vpack.c.bf16 (!%p1011_p5), %v772_v61, %v771_v60 }
 0x2cc   : > { %v1274_v0 = vpop.eup %1273 }
 0x2cd   : > { %v1276_v1 = vpop.eup %1275  ;;  %v599_v2 = vadd.f32 1.0, %v1274_v0  ;;  %v773_v0 = vld [vmem:[#allocation10 + $0x60] sm:$0xff] (!%p1011_p5) }
 0x2ce   : > { %v1278_v3 = vpop.eup %1277  ;;  %v600_v4 = vadd.f32 1.0, %v1276_v1  ;;  %v774_v1 = vld [vmem:[#allocation10 + $0x68] sm:$0xff] (!%p1011_p5) }
 0x2cf   : > { %v1280_v5 = vpop.eup %1279  ;;  %1281 = vrcp.f32 %v599_v2  ;;  %v601_v6 = vadd.f32 1.0, %v1278_v3  ;;  %v1141_v3 = vpack.c.bf16 (!%p1011_p5), %v774_v1, %v773_v0 }
 0x2d0   : > { %1283 = vrcp.f32 %v600_v4  ;;  %v602_v7 = vadd.f32 1.0, %v1280_v5  ;;  %v775_v4 = vld [vmem:[#allocation10 + $0x70] sm:$0xff] (!%p1011_p5)  ;;  %v776_v5 = vld [vmem:[#allocation10 + $0x78] sm:$0xff] (!%p1011_p5) }
 0x2d1   : > { %1285 = vrcp.f32 %v601_v6 }
 0x2d2   : > { %1287 = vrcp.f32 %v602_v7  ;;  %v1144_v7 = vpack.c.bf16 (!%p1011_p5), %v776_v5, %v775_v4 }
 0x2d9   : > { %v1282_v8 = vpop.eup %1281 }
 0x2da   : > { %v1284_v9 = vpop.eup %1283  ;;  %v723_v10 = vmul.f32 %v1282_v8, %v1750_v37  ;;  %v725_v24 = vsub.f32 1.0, %v1282_v8 }
 0x2db   : > { %v1286_v11 = vpop.eup %1285  ;;  %v611_v12 = vmul.f32 %v1284_v9, %v1750_v37  ;;  %v747_v37 = vld [vmem:[#allocation3] sm:$0xff] }
 0x2dc   : > { %v1288_v13 = vpop.eup %1287  ;;  %v724_v14 = vmul.f32 %v1286_v11, %v1748_v36  ;;  %v726_v28 = vsub.f32 1.0, %v1286_v11  ;;  %v777_v9 = vld [vmem:[%s1820_s5] sm:$0x1] (!%p1011_p5) }
 0x2dd   : > { %v612_v15 = vmul.f32 %v1288_v13, %v1748_v36 }
 0x2df   : > { %v613_v16 = vpack.c.bf16 %v612_v15, %v611_v12 }
 0x2e1   : > { %1076 = vmatmul.mubr.bf16.vlgmr.msra.gmra.mrb[4].mxu0 %v613_v16 }
 0x2e2   : > { %1111 = vmatprep.mubr.msk.f32.mxu0 (!%p1011_p5), %vm1500_vm6, %v1501_v46  ;;  %1124 = vmatpush3.bf16.msra.mxu0 (!%p1011_p5), %v1123_v44 }
 0x2e3   : > { %1125 = vmatprep.subr.bf16.mxu0 (!%p1011_p5), %v1499_v43 }
 0x2e6   : > { %1127 = vmatpush3.bf16.msra.mxu0 (!%p1011_p5), %v1126_v47 }
 0x2e7   : > { %1128 = vmatprep.subr.bf16.mxu0 (!%p1011_p5), %v1499_v43 }
 0x2ea   : > { %1130 = vmatpush3.bf16.msra.mxu0 (!%p1011_p5), %v1129_v50 }
 0x2eb   : > { %1131 = vmatprep.subr.bf16.mxu0 (!%p1011_p5), %v1499_v43 }
 0x2ee   : > { %1133 = vmatpush3.bf16.msra.mxu0 (!%p1011_p5), %v1132_v55 }
 0x2ef   : > { %1134 = vmatprep.subr.bf16.mxu0 (!%p1011_p5), %v1499_v43 }
 0x2f2   : > { %1136 = vmatpush3.bf16.msra.mxu0 (!%p1011_p5), %v1135_v59 }
 0x2f3   : > { %1137 = vmatprep.subr.bf16.mxu0 (!%p1011_p5), %v1499_v43 }
 0x2f6   : > { %1139 = vmatpush3.bf16.msra.mxu0 (!%p1011_p5), %v1138_v63 }
 0x2f7   : > { %1140 = vmatprep.subr.bf16.mxu0 (!%p1011_p5), %v1499_v43 }
 0x2fa   : > { %1142 = vmatpush3.bf16.msra.mxu0 (!%p1011_p5), %v1141_v3 }
 0x2fb   : > { %1143 = vmatprep.subr.bf16.mxu0 (!%p1011_p5), %v1499_v43 }
 0x2fe   : > { %1145 = vmatpush3.bf16.msra.mxu0 (!%p1011_p5), %v1144_v7 }
 0x3b4   : > { %v712_v18 = vpop.f32.mrb[4].mxu0 }
 0x3b5   : > { %v719_v19 = vadd.f32 %v712_v18, %v442_v17  ;;  %v1077_v20 = vpop.f32.mrb[5].mxu0 }
 0x3b6   : > { %v715_v21 = vpop.f32.mrb[6].mxu0 }
 0x3b7   : > { %1289 = vtanh.f32 %v719_v19  ;;  %v720_v22 = vadd.f32 %v715_v21, %v442_v17  ;;  %v1078_v23 = vpop.f32.mrb[7].mxu0 }
 0x3b9   : > { %1291 = vtanh.f32 %v720_v22 }
 0x3c1   : > { %v1290_v25 = vpop.eup %1289 }
 0x3c2   : > { %v727_v27 = vmul.f32 %v1290_v25, %v725_v24 }
 0x3c3   : > { %v1292_v30 = vpop.eup %1291 }
 0x3c4   : > { %v729_v31 = vadd.f32 %v727_v27, %v723_v10  ;;  %v728_v32 = vmul.f32 %v1292_v30, %v726_v28 }
 0x3c6   : > { %v730_v33 = vadd.f32 %v728_v32, %v724_v14  ;;  %v741_v35 = vadd.f32 %v734_v26, %v729_v31 }
 0x3c8   : > { %v742_v36 = vadd.f32 %v739_v34, %v730_v33  ;;  %753 = sbr.rel (%p1011_p5) target bundleno = 1525 (0x5f5), region = 68 }
 0x3ca   : > { %v743_v38 = vmax.f32 %v741_v35, %v742_v36 }
 0x3cc   : > { %746 = vst [vmem:[%s745_s8] sm:$0xff] %v743_v38  ;;  %v748_v39 = vmax.f32 %v747_v37, %v743_v38 }
 0x3ce   : > { %749 = vst [vmem:[#allocation3] sm:$0xff] %v748_v39 }
 0x3d5   : > { %v754_v51 = vld [vmem:[#allocation3] sm:$0xff] }
 0x3d6   : > { %v755_v54 = vrot.slane %v754_v51, 4 }
 0x3d8   : > { %v756_v58 = vmax.f32 %v754_v51, %v755_v54 }
 0x3da   : > { %v757_v62 = vrot.slane %v756_v58, 2 }
 0x3dc   : > { %v758_v2 = vmax.f32 %v756_v58, %v757_v62 }
 0x3de   : > { %v759_v6 = vrot.slane %v758_v2, 1 }
 0x3e0   : > { %v760_v8 = vmax.f32 %v758_v2, %v759_v6 }
 0x3e2   : > { %1112 = vmatmul.mubr.f32.vlgmr.msra.gmra.mrb[0].mxu0 %v760_v8 }
 0x4b5   : > { %v844_v10 = vpop.f32.mrb[0].mxu0 }
 0x4b6   : > { %v845_v11 = vadd.f32 %v844_v10, %v777_v9  ;;  %v1113_v12 = vpop.f32.mrb[1].mxu0 }
 0x4b8   : > { %v849_v13 = vsel %vm848_vm7, %v845_v11, -1e+30 }
 0x4b9   : > { %v851_v14 = vsel %vm850_vm8, %v849_v13, -inf }
 0x4ba   : > { %852 = vmax.xlane.f32.xlu0 %v851_v14 }
 0x547   : > { %v853_v15 = vpop.xlane.xlu0 %852 }
 0x548   : > { %v854_v16 = vsub.f32 %v849_v13, %v853_v15 }
 0x54a   : > { %v855_v17 = vmul.f32 1.442695, %v854_v16 }
 0x54c   : > { %1293 = vpow2.f32 %v855_v17 }
 0x556   : > { %v1294_v18 = vpop.eup %1293 }
 0x557   : > { %v857_v19 = vsel %vm848_vm7, %v1294_v18, 0.0 }
 0x558   : > { %v858_v20 = vsel %vm850_vm8, %v857_v19, 0.0 }
 0x559   : > { %859 = vadd.xlane.f32.xlu0 %v858_v20 }
 0x5e6   : > { %v860_v21 = vpop.xlane.xlu0 %859 }
 0x5e7   : > { %1295 = vrcp.f32 %v860_v21 }
 0x5f1   : > { %v1296_v22 = vpop.eup %1295 }
 0x5f2   : > { %v862_v23 = vmul.f32 %v1296_v22, %v857_v19 }
 0x5f4   : > { %863 = vst [vmem:[#allocation12] sm:$0x1] %v862_v23 }
 0x5f5 PF: > { %p1188_p6 = scmp.eq.s32.totalorder %s1557_s25, 2  ;;  %s1502_s16 = smov [#allocation12]  }
 0x5f6   : > { %s871_s14 = sshll.u32 %s1502_s16, 4  ;;  %s872_s14 = int_to_ptr.vmem [resolvable:$true] %s871_s14 }
 0x5f7   : > { %s1411_s17 = scalar_lea.vmem %s872_s14, 16  ;;  %s1417_s20 = scalar_lea.vmem %s872_s14, 32 }
 0x5f8   : > { %p1412_p8 = scmp.ne.s32.totalorder %s872_s14, %s1411_s17  ;;  %p1418_p2 = scmp.lt.s32.totalorder %s872_s14, %s872_s14 }
 0x5f9   : > { %p1419_p13 = scmp.lt.s32.totalorder %s1417_s20, %s1411_s17 }
 0x5fa   : > { %p1413_p12 = pnand %p1412_p8, %p1188_p6 }
 0x5fb   : > { %p1420_p11 = por %p1419_p13, %p1418_p2 }
 0x5fc   : > { %p1414_p0 = pneg %p1413_p12 }
 0x5fe   : > { %p1421_p3 = pnand %p1420_p11, %p1414_p0 }
 0x600   : > { %1424 = shalt.err (!%p1421_p3)
}
 0x601   : > { %s1425_s11 = scalar_lea.hbm %s1821_s6, 16 }
 0x602   : > { %p1426_p9 = scmp.ne.s32.totalorder %s1821_s6, %s1425_s11  ;;  %p1431_p1 = scmp.lt.u32.totalorder %s1425_s11, %s1821_s6 }
 0x604   : > { %p1427_p7 = pnand %p1426_p9, %p1188_p6 }
 0x606   : > { %p1428_p10 = pneg %p1427_p7 }
 0x608   : > { %p1433_p4 = pnand %p1431_p1, %p1428_p10 }
 0x60a   : > { %1436 = shalt.err (!%p1433_p4)
}
 0x60b   : > { %1164 = dma.vmem_to_hbm [thread:$0]  (%p1188_p6), %s872_s14, 16, %s1821_s6, [#allocation6]  }
 0x60c   : > { %1466 = dma.done.wait (%p1188_p6), [#allocation6], 16  }
 0x60d   : > { %1468 = vsyncadd (%p1188_p6), [#allocation6], 4294967280 }
 0x60e PF: > { %p19_p5 = scmp.ge.s32.totalorder %s1635_s7, 5   ;;  %s1839_s21 = smov %s1475_s22 }
 0x60f   : > { %s1840_s22 = smov %s1479_s23  ;;  %s1841_s23 = smov %s1666_s30 }
 0x610   : > { %s1842_s24 = smov %s1635_s7  ;;  %21 = sbr.rel (!%p19_p5) target bundleno = 6 (0x6), region = 105 }
 0x617   :  { %884 = vsyncpa [#allocation5], 1 }
 0x618   :  { %886 = vsyncpa [#allocation5 + $0x1], 1 }
 0x619   :  { %887 = vsyncpa [#allocation8], 1 }
 0x61a   :  { %888 = vsyncpa [#allocation11], 1 }
 0x61b   :  { %889 = vsyncpa [#allocation6], 1 }
 0x61c   :  { %891 = vsyncpa [#allocation6 + $0x1], 1 }

</bundles_post_ra>
